<compile_context>
chip_gen: v7x
topology: tpu7x:2x2x1
jax: 0.10.0
libtpu: 0.0.40
codegen_flags: <defaults>
</compile_context>

<pallas_src>
import functools

import jax
import jax.numpy as jnp
import numpy as np
from jax import lax
from jax.experimental import pallas as pl
from jax.experimental.pallas import tpu as pltpu

QMIN = -128.0   # int8 lower_bound
QMAX = 127.0    # int8 upper_bound
EPS = float(jnp.finfo(jnp.float32).eps)

_LANE_MIN = 128
_LANE_CANDIDATES = (1024, 512, 256, 128)
_TARGET_BLOCK_BYTES = 2 * 1024 * 1024     # ~2 MiB input block (native dtype)
_VMEM_LIMIT_BYTES = 32 * 1024 * 1024      # headroom for f32 temps of bf16 blocks


# ------------------------------ kernels ----------------------------------- #

def _make_minmax_kernel(block_rows, total_rows, num_blocks, lane):
    """Global min/max.  Grid = (2 cores [parallel], blocks-per-core [arbitrary]).

    Core c handles blocks b = 2*i + c (round robin).  Invalid rows (ragged
    tail of the 2-D view, or the phantom block when num_blocks is odd) are
    neutralized with -inf/+inf.  Each core writes an (8,128) slab filled with
    its partial max/min; the tiny cross-core combine happens in XLA glue.
    """
    need_mask = (total_rows % block_rows != 0) or (num_blocks % 2 != 0)

    def kernel(x_ref, max_ref, min_ref, mx_sc, mn_sc):
        c = pl.program_id(0)            # core-split axis
        i = pl.program_id(1)            # reduction axis

        @pl.when(i == 0)
        def _():
            mx_sc[...] = jnp.full_like(mx_sc, -jnp.inf)
            mn_sc[...] = jnp.full_like(mn_sc, jnp.inf)

        xb = x_ref[...].astype(jnp.float32)
        if need_mask:
            b = i * 2 + c               # un-clamped block index
            row_ids = b * block_rows + lax.broadcasted_iota(
                jnp.int32, (block_rows, lane), 0)
            valid = row_ids < total_rows
            xb_max = jnp.where(valid, xb, -jnp.inf)
            xb_min = jnp.where(valid, xb, jnp.inf)
        else:
            xb_max = xb
            xb_min = xb

        # Per-block: VPU elementwise max/min + one small sublane (XLU) reduce.
        mx_sc[...] = jnp.maximum(mx_sc[...],
                                 jnp.max(xb_max, axis=0, keepdims=True))
        mn_sc[...] = jnp.minimum(mn_sc[...],
                                 jnp.min(xb_min, axis=0, keepdims=True))

        @pl.when(i == pl.num_programs(1) - 1)
        def _():
            # Single cross-lane reduce per core, broadcast into the (8,128) out.
            max_ref[...] = jnp.zeros_like(max_ref) + jnp.max(mx_sc[...])
            min_ref[...] = jnp.zeros_like(min_ref) + jnp.min(mn_sc[...])

    return kernel


def _fakequant_kernel(sz_ref, x_ref, o_ref):
    """Elementwise fake quant.  sz_ref = [inv_scale, scale] in SMEM.

    zero_point is 0 for the symmetric int8 path, so it is folded away.
    """
    inv_scale = sz_ref[0]
    scale = sz_ref[1]
    xf = x_ref[...].astype(jnp.float32)
    q = jnp.clip(jnp.round(xf * inv_scale), QMIN, QMAX)
    o_ref[...] = (q * scale).astype(o_ref.dtype)


# ------------------------------ wrapper ------------------------------------ #

@functools.partial(jax.jit, static_argnames=("quant", "block_rows"))
def qact_forward(x, *, quant=True, block_rows=None):
    """QAct.forward (calibrate=True, last_calibrate=True, quant=`quant`),
    matching UniformQuantizer(int8) + MinmaxObserver(layer_wise)."""
    if not quant:
        return x

    orig_shape = x.shape
    orig_dtype = x.dtype
    flat = x.reshape(-1)                       # free reshape, native dtype
    n = flat.shape[0]

    # Rare path: numel not a multiple of 128 -> pad with element 0 (min/max
    # neutral); padded outputs are sliced off at the end.
    pad = (-n) % _LANE_MIN
    if pad:
        flat = jnp.concatenate([flat, jnp.broadcast_to(flat[:1], (pad,))])
    n_pad = n + pad

    # Lane-dense 2-D view (free reshape since lane | n_pad).
    lane = next(l for l in _LANE_CANDIDATES if n_pad % l == 0)
    rows = n_pad // lane
    x2d = flat.reshape(rows, lane)

    # Row tiling: ~2 MiB input blocks in the native dtype.
    itemsize = jnp.dtype(orig_dtype).itemsize
    target_rows = max(8, (_TARGET_BLOCK_BYTES // (lane * itemsize)) // 8 * 8)
    if block_rows is None:
        br = min(rows, target_rows)
    else:
        br = min(block_rows, rows)
    if br < rows:
        br = max(8, (br // 8) * 8)             # keep (8, 128) tiling legal
        if br >= rows:
            br = rows                          # full-extent block is always legal
    nb = pl.cdiv(rows, br)                     # number of row blocks
    nb_half = pl.cdiv(nb, 2)                   # blocks per core (2-way split)

    # ---- 1) observer: global min / max ------------------------------------
    def x_index_map(c, i):
        b = i * 2 + c                          # round-robin blocks over cores
        if nb % 2 != 0:                        # static: clamp the phantom block
            b = jnp.minimum(b, nb - 1)
        return (b, 0)

    max_part, min_part = pl.pallas_call(
        _make_minmax_kernel(br, rows, nb, lane),
        out_shape=(jax.ShapeDtypeStruct((16, 128), jnp.float32),
                   jax.ShapeDtypeStruct((16, 128), jnp.float32)),
        grid_spec=pltpu.PrefetchScalarGridSpec(
            num_scalar_prefetch=0,
            grid=(2, nb_half),
            in_specs=[pl.BlockSpec((br, lane), x_index_map)],
            out_specs=[pl.BlockSpec((8, 128), lambda c, i: (c, 0)),
                       pl.BlockSpec((8, 128), lambda c, i: (c, 0))],
            scratch_shapes=[pltpu.VMEM((1, lane), jnp.float32),
                            pltpu.VMEM((1, lane), jnp.float32)]),
        compiler_params=pltpu.CompilerParams(
            dimension_semantics=("parallel", "arbitrary"),
            vmem_limit_bytes=_VMEM_LIMIT_BYTES),
    )(x2d)

    # ---- 2) quantization params (tiny scalar glue; symmetric int8, zp=0) ---
    max_val = jnp.max(max_part)
    min_val = jnp.min(min_part)
    abs_max = jnp.maximum(-min_val, max_val)
    scale = jnp.maximum(abs_max / ((QMAX - QMIN) / 2.0), EPS)     # / 127.5
    inv_scale = 1.0 / scale
    sz = jnp.stack([inv_scale, scale]).astype(jnp.float32)        # (2,) -> SMEM

    # ---- 3) fake quant (streaming elementwise pass, native dtype I/O) ------
    out2d = pl.pallas_call(
        _fakequant_kernel,
        out_shape=jax.ShapeDtypeStruct((rows, lane), orig_dtype),
        grid_spec=pltpu.PrefetchScalarGridSpec(
            num_scalar_prefetch=1,
            grid=(nb,),
            in_specs=[pl.BlockSpec((br, lane), lambda i, sz: (i, 0))],
            out_specs=pl.BlockSpec((br, lane), lambda i, sz: (i, 0))),
        compiler_params=pltpu.CompilerParams(
            dimension_semantics=("parallel",),
            vmem_limit_bytes=_VMEM_LIMIT_BYTES),
    )(sz, x2d)

    out = out2d.reshape(-1)
    if pad:
        out = out[:n]
    return out.reshape(orig_shape)


# Pure-JAX reference (mirrors the PyTorch module; uses the same 1/scale
# multiply as the kernel — differs from torch's x/scale only in astronomically
# rare round-half ties, by at most one quantization step).
# TODO(synk): the stateful running min/max across multiple calibration calls
# (observer.update accumulation) is host-side module state, not a kernel;
# this implements a single forward with calibrate + last_calibrate + quant.
def _qact_reference(x):
    xf = x.astype(jnp.float32)
    abs_max = jnp.maximum(-jnp.min(xf), jnp.max(xf))
    scale = jnp.maximum(abs_max / 127.5, EPS)
    inv_scale = 1.0 / scale
    q = jnp.clip(jnp.round(xf * inv_scale), QMIN, QMAX)
    return (q * scale).astype(x.dtype)


if __name__ == "__main__":
    key = jax.random.PRNGKey(0)

    # 1) Standard NCHW activation, f32 (numel is a multiple of 128).
    x = jax.random.normal(key, (2, 4, 16, 16), dtype=jnp.float32)
    y = jax.block_until_ready(qact_forward(x, quant=True))
    np.testing.assert_allclose(np.asarray(y), np.asarray(_qact_reference(x)),
                               rtol=1e-6, atol=1e-6)
    assert y.shape == x.shape and y.dtype == x.dtype

    # 2) Multi-block, odd block count and ragged last block (exercises the
    #    in-kernel masking, phantom-block clamp and 2-core round-robin split).
    k2 = jax.random.split(key)[0]
    x2 = jax.random.normal(k2, (4, 4, 24, 96), dtype=jnp.float32)
    y2 = jax.block_until_ready(qact_forward(x2, quant=True, block_rows=16))
    np.testing.assert_allclose(np.asarray(y2), np.asarray(_qact_reference(x2)),
                               rtol=1e-6, atol=1e-6)

    # 3) bf16, numel not a multiple of 128 (padding path, in-kernel dtype cast).
    k3 = jax.random.split(key)[1]
    x3 = jax.random.normal(k3, (3, 5, 7, 11), dtype=jnp.bfloat16)
    y3 = jax.block_until_ready(qact_forward(x3, quant=True))
    np.testing.assert_allclose(
        np.asarray(jnp.asarray(y3, jnp.float32)),
        np.asarray(jnp.asarray(_qact_reference(x3), jnp.float32)),
        rtol=0, atol=5e-2)
    assert y3.shape == x3.shape and y3.dtype == x3.dtype

    print("KERNEL_OK")
</pallas_src>

<mosaic_0001>
module attributes {stable_mosaic.version = 11 : i64} {
  func.func @kernel(%arg0: i32, %arg1: i32, %arg2: memref<2x1024xf32, #tpu.memory_space<vmem>>, %arg3: memref<8x128xf32, #tpu.memory_space<vmem>>, %arg4: memref<8x128xf32, #tpu.memory_space<vmem>>, %arg5: memref<1x1024xf32, #tpu.memory_space<vmem>>, %arg6: memref<1x1024xf32, #tpu.memory_space<vmem>>) attributes {dimension_semantics = [#tpu.dimension_semantics<parallel>, #tpu.dimension_semantics<arbitrary>], iteration_bounds = array<i64: 2, 1>, scalar_prefetch = 0 : i64, scratch_operands = 2 : i64, tpu.core_type = #tpu.core_type<tc>, window_params = [{transform_indices = @transform_0, window_bounds = array<i64: 2, 1024>}, {transform_indices = @transform_1, window_bounds = array<i64: 8, 128>}, {transform_indices = @transform_2, window_bounds = array<i64: 8, 128>}]} {
    %c0_i32 = arith.constant 0 : i32
    %0 = arith.cmpi eq, %arg1, %c0_i32 : i32
    %1 = arith.extui %0 : i1 to i32
    %c0_i32_0 = arith.constant 0 : i32
    %2 = arith.cmpi ne, %1, %c0_i32_0 : i32
    scf.if %2 {
      %cst_17 = arith.constant 0xFF800000 : f32
      %29 = vector.broadcast %cst_17 : f32 to vector<1x1024xf32>
      %c0_18 = arith.constant 0 : index
      %c0_19 = arith.constant 0 : index
      %30 = vector.load %arg5[%c0_18, %c0_19] : memref<1x1024xf32, #tpu.memory_space<vmem>>, vector<1x1024xf32>
      tpu.vector_store %arg5[%c0_18, %c0_19], %29 {strides = array<i32>} : memref<1x1024xf32, #tpu.memory_space<vmem>>, vector<1x1024xf32>,
      %cst_20 = arith.constant 0x7F800000 : f32
      %31 = vector.broadcast %cst_20 : f32 to vector<1x1024xf32>
      %c0_21 = arith.constant 0 : index
      %c0_22 = arith.constant 0 : index
      %32 = vector.load %arg6[%c0_21, %c0_22] : memref<1x1024xf32, #tpu.memory_space<vmem>>, vector<1x1024xf32>
      tpu.vector_store %arg6[%c0_21, %c0_22], %31 {strides = array<i32>} : memref<1x1024xf32, #tpu.memory_space<vmem>>, vector<1x1024xf32>,
    } else {
    }
    %c0 = arith.constant 0 : index
    %c0_1 = arith.constant 0 : index
    %3 = vector.load %arg2[%c0, %c0_1] : memref<2x1024xf32, #tpu.memory_space<vmem>>, vector<2x1024xf32>
    %c2_i32 = arith.constant 2 : i32
    %4 = arith.muli %arg1, %c2_i32 : i32
    %5 = arith.addi %4, %arg0 : i32
    %c2_i32_2 = arith.constant 2 : i32
    %6 = arith.muli %5, %c2_i32_2 : i32
    %7 = tpu.iota {dimensions = array<i32: 0>} : vector<2x1024xi32>
    %8 = vector.broadcast %6 : i32 to vector<2x1024xi32>
    %9 = arith.addi %8, %7 : vector<2x1024xi32>
    %c2_i32_3 = arith.constant 2 : i32
    %10 = vector.broadcast %c2_i32_3 : i32 to vector<2x1024xi32>
    %11 = arith.cmpi slt, %9, %10 : vector<2x1024xi32>
    %cst = arith.constant 0xFF800000 : f32
    %12 = vector.broadcast %cst : f32 to vector<2x1024xf32>
    %13 = arith.select %11, %3, %12 : vector<2x1024xi1>, vector<2x1024xf32>
    %cst_4 = arith.constant 0x7F800000 : f32
    %14 = vector.broadcast %cst_4 : f32 to vector<2x1024xf32>
    %15 = arith.select %11, %3, %14 : vector<2x1024xi1>, vector<2x1024xf32>
    %c0_5 = arith.constant 0 : index
    %c0_6 = arith.constant 0 : index
    %16 = vector.load %arg5[%c0_5, %c0_6] : memref<1x1024xf32, #tpu.memory_space<vmem>>, vector<1x1024xf32>
    %cst_7 = arith.constant dense<0xFF800000> : vector<1024xf32>
    %17 = vector.multi_reduction <maximumf>, %13, %cst_7 [0] : vector<2x1024xf32> to vector<1024xf32>
    %18 = vector.shape_cast %17 : vector<1024xf32> to vector<1x1024xf32>
    %19 = arith.maximumf %16, %18 : vector<1x1024xf32>
    %c0_8 = arith.constant 0 : index
    %c0_9 = arith.constant 0 : index
    %20 = vector.load %arg5[%c0_8, %c0_9] : memref<1x1024xf32, #tpu.memory_space<vmem>>, vector<1x1024xf32>
    tpu.vector_store %arg5[%c0_8, %c0_9], %19 {strides = array<i32>} : memref<1x1024xf32, #tpu.memory_space<vmem>>, vector<1x1024xf32>,
    %c0_10 = arith.constant 0 : index
    %c0_11 = arith.constant 0 : index
    %21 = vector.load %arg6[%c0_10, %c0_11] : memref<1x1024xf32, #tpu.memory_space<vmem>>, vector<1x1024xf32>
    %cst_12 = arith.constant dense<0x7F800000> : vector<1024xf32>
    %22 = vector.multi_reduction <minimumf>, %15, %cst_12 [0] : vector<2x1024xf32> to vector<1024xf32>
    %23 = vector.shape_cast %22 : vector<1024xf32> to vector<1x1024xf32>
    %24 = arith.minimumf %21, %23 : vector<1x1024xf32>
    %c0_13 = arith.constant 0 : index
    %c0_14 = arith.constant 0 : index
    %25 = vector.load %arg6[%c0_13, %c0_14] : memref<1x1024xf32, #tpu.memory_space<vmem>>, vector<1x1024xf32>
    tpu.vector_store %arg6[%c0_13, %c0_14], %24 {strides = array<i32>} : memref<1x1024xf32, #tpu.memory_space<vmem>>, vector<1x1024xf32>,
    %c0_i32_15 = arith.constant 0 : i32
    %26 = arith.cmpi eq, %arg1, %c0_i32_15 : i32
    %27 = arith.extui %26 : i1 to i32
    %c0_i32_16 = arith.constant 0 : i32
    %28 = arith.cmpi ne, %27, %c0_i32_16 : i32
    scf.if %28 {
      %cst_17 = arith.constant 0.000000e+00 : f32
      %29 = vector.broadcast %cst_17 : f32 to vector<8x128xf32>
      %c0_18 = arith.constant 0 : index
      %c0_19 = arith.constant 0 : index
      %30 = vector.load %arg5[%c0_18, %c0_19] : memref<1x1024xf32, #tpu.memory_space<vmem>>, vector<1x1024xf32>
      %31 = vector.shape_cast %30 : vector<1x1024xf32> to vector<1x1x1024xf32>
      %cst_20 = arith.constant dense<0xFF800000> : vector<1xf32>
      %32 = vector.multi_reduction <maximumf>, %31, %cst_20 [1, 2] : vector<1x1x1024xf32> to vector<1xf32>
      %33 = vector.shape_cast %32 : vector<1xf32> to vector<1x1x1xf32>
      %34 = vector.extract %33[0, 0, 0] : f32 from vector<1x1x1xf32>
      %35 = vector.broadcast %34 : f32 to vector<8x128xf32>
      %36 = arith.addf %29, %35 : vector<8x128xf32>
      %c0_21 = arith.constant 0 : index
      %c0_22 = arith.constant 0 : index
      %37 = vector.load %arg3[%c0_21, %c0_22] : memref<8x128xf32, #tpu.memory_space<vmem>>, vector<8x128xf32>
      tpu.vector_store %arg3[%c0_21, %c0_22], %36 {strides = array<i32>} : memref<8x128xf32, #tpu.memory_space<vmem>>, vector<8x128xf32>,
      %cst_23 = arith.constant 0.000000e+00 : f32
      %38 = vector.broadcast %cst_23 : f32 to vector<8x128xf32>
      %c0_24 = arith.constant 0 : index
      %c0_25 = arith.constant 0 : index
      %39 = vector.load %arg6[%c0_24, %c0_25] : memref<1x1024xf32, #tpu.memory_space<vmem>>, vector<1x1024xf32>
      %40 = vector.shape_cast %39 : vector<1x1024xf32> to vector<1x1x1024xf32>
      %cst_26 = arith.constant dense<0x7F800000> : vector<1xf32>
      %41 = vector.multi_reduction <minimumf>, %40, %cst_26 [1, 2] : vector<1x1x1024xf32> to vector<1xf32>
      %42 = vector.shape_cast %41 : vector<1xf32> to vector<1x1x1xf32>
      %43 = vector.extract %42[0, 0, 0] : f32 from vector<1x1x1xf32>
      %44 = vector.broadcast %43 : f32 to vector<8x128xf32>
      %45 = arith.addf %38, %44 : vector<8x128xf32>
      %c0_27 = arith.constant 0 : index
      %c0_28 = arith.constant 0 : index
      %46 = vector.load %arg4[%c0_27, %c0_28] : memref<8x128xf32, #tpu.memory_space<vmem>>, vector<8x128xf32>
      tpu.vector_store %arg4[%c0_27, %c0_28], %45 {strides = array<i32>} : memref<8x128xf32, #tpu.memory_space<vmem>>, vector<8x128xf32>,
    } else {
    }
    return
  }
  func.func @transform_0(%arg0: i32, %arg1: i32) -> (i32, i32) {
    %c2_i32 = arith.constant 2 : i32
    %0 = arith.muli %arg1, %c2_i32 : i32
    %1 = arith.addi %0, %arg0 : i32
    %c0_i32 = arith.constant 0 : i32
    %2 = arith.minsi %1, %c0_i32 : i32
    %c0_i32_0 = arith.constant 0 : i32
    %c0_i32_1 = arith.constant 0 : i32
    return %2, %c0_i32_0 : i32, i32
  }
  func.func @transform_1(%arg0: i32, %arg1: i32) -> (i32, i32) {
    %c0_i32 = arith.constant 0 : i32
    %c0_i32_0 = arith.constant 0 : i32
    return %arg0, %c0_i32 : i32, i32
  }
  func.func @transform_2(%arg0: i32, %arg1: i32) -> (i32, i32) {
    %c0_i32 = arith.constant 0 : i32
    %c0_i32_0 = arith.constant 0 : i32
    return %arg0, %c0_i32 : i32, i32
  }
}

module attributes {stable_mosaic.version = 11 : i64} {
  func.func @_fakequant_kernel(%arg0: i32, %arg1: memref<2xf32, #tpu.memory_space<smem>>, %arg2: memref<2x1024xf32, #tpu.memory_space<vmem>>, %arg3: memref<2x1024xf32, #tpu.memory_space<vmem>>) attributes {dimension_semantics = [#tpu.dimension_semantics<parallel>], iteration_bounds = array<i64: 1>, scalar_prefetch = 1 : i64, scratch_operands = 0 : i64, tpu.core_type = #tpu.core_type<tc>, window_params = [{transform_indices = @transform_0, window_bounds = array<i64: 2, 1024>}, {transform_indices = @transform_1, window_bounds = array<i64: 2, 1024>}]} {
    %c0 = arith.constant 0 : index
    %0 = memref.load %arg1[%c0] : memref<2xf32, #tpu.memory_space<smem>>
    %c1 = arith.constant 1 : index
    %1 = memref.load %arg1[%c1] : memref<2xf32, #tpu.memory_space<smem>>
    %c0_0 = arith.constant 0 : index
    %c0_1 = arith.constant 0 : index
    %2 = vector.load %arg2[%c0_0, %c0_1] : memref<2x1024xf32, #tpu.memory_space<vmem>>, vector<2x1024xf32>
    %3 = vector.broadcast %0 : f32 to vector<2x1024xf32>
    %4 = arith.mulf %2, %3 : vector<2x1024xf32>
    %5 = math.roundeven %4 : vector<2x1024xf32>
    %cst = arith.constant -1.280000e+02 : f32
    %cst_2 = arith.constant 1.270000e+02 : f32
    %6 = vector.broadcast %cst : f32 to vector<2x1024xf32>
    %7 = arith.maximumf %6, %5 : vector<2x1024xf32>
    %8 = vector.broadcast %cst_2 : f32 to vector<2x1024xf32>
    %9 = arith.minimumf %8, %7 : vector<2x1024xf32>
    %10 = vector.broadcast %1 : f32 to vector<2x1024xf32>
    %11 = arith.mulf %9, %10 : vector<2x1024xf32>
    %c0_3 = arith.constant 0 : index
    %c0_4 = arith.constant 0 : index
    %12 = vector.load %arg3[%c0_3, %c0_4] : memref<2x1024xf32, #tpu.memory_space<vmem>>, vector<2x1024xf32>
    tpu.vector_store %arg3[%c0_3, %c0_4], %11 {strides = array<i32>} : memref<2x1024xf32, #tpu.memory_space<vmem>>, vector<2x1024xf32>,
    return
  }
  func.func @transform_0(%arg0: i32, %arg1: memref<2xf32, #tpu.memory_space<smem>>) -> (i32, i32) {
    %c0_i32 = arith.constant 0 : i32
    %c0_i32_0 = arith.constant 0 : i32
    return %arg0, %c0_i32 : i32, i32
  }
  func.func @transform_1(%arg0: i32, %arg1: memref<2xf32, #tpu.memory_space<smem>>) -> (i32, i32) {
    %c0_i32 = arith.constant 0 : i32
    %c0_i32_0 = arith.constant 0 : i32
    return %arg0, %c0_i32 : i32, i32
  }
}

</mosaic_0001>

<bundles_post_ra>
// kernel: qact_forward.3
= control target key start
LH: loop header
LB: loop body
LE: loop exit
PB: predicated region body
PF: predicated region fallthrough
CT: control target
= control target key end

     0   :  { %s86_s0 = inlined_call_operand.vmem [shape: f32[2], index: 0, kind: input, shape index: {}]   ;;  %s87_s1 = inlined_call_operand.vmem [shape: f32[2,1024], index: 1, kind: input, shape index: {}]   ;;  %s88_s2 = inlined_call_operand.vmem [shape: f32[2,1024], index: 2, kind: output, shape index: {}]  }
   0x1   :  { %s7_s11 = sshll.u32 %s86_s0, 4  ;;  %s8_s11 = int_to_ptr.vmem [resolvable:$true] %s7_s11 }
   0x2   :  { %s41_s12 = scalar_lea.vmem %s8_s11, 16  ;;  %p46_p1 = scmp.lt.s32.totalorder %s8_s11, %s8_s11 }
   0x3   :  { %p42_p0 = scmp.ne.s32.totalorder %s8_s11, %s41_s12  ;;  %p47_p2 = scmp.lt.s32.totalorder %s41_s12, %s41_s12 }
   0x5   :  { %p48_p3 = por %p47_p2, %p46_p1 }
   0x7   :  { %p49_p4 = pnand %p48_p3, %p42_p0 }
   0x9   :  { %52 = shalt.err (!%p49_p4)  }
   0xa   :  { %s55_s13 = smov [#allocation3]  }
   0xb   :  { %10 = dma.vmem_to_smem %s8_s11, 16, %s55_s13, [#allocation2] }
   0xc   :  { %53 = dma.done.wait [#allocation2], 16 }
   0xd   :  { %54 = vsyncadd [#allocation2], 4294967280 }
   0xe   :  { %12 = sfence }
   0xf   :  { %s15_s14 = sld [smem:[#allocation3]]  ;;  %s37_s15 = sld [smem:[#allocation3 + $0x1]]  ;;  %v17_v0 = vld [vmem:[%s87_s1] sm:$0xff]  ;;  %v18_v1 = vld [vmem:[%s87_s1 + $0x8] sm:$0xff] }
  0x15   :  { %v19_v2 = vstv %s15_s14  ;;  %v28_v9 = vstv %s37_s15 }
  0x16   :  { %v20_v3 = vmul.f32 %v19_v2, %v17_v0  ;;  %v21_v4 = vmul.f32 %v19_v2, %v18_v1 }
  0x18   :  { %v38_v5 = vround.rtne.f32 %v20_v3  ;;  %v39_v6 = vround.rtne.f32 %v21_v4 }
  0x1a   :  { %v24_v7 = vmax.f32 %v38_v5, -128.0  ;;  %v25_v8 = vmax.f32 %v39_v6, -128.0 }
  0x1c   :  { %v26_v10 = vmin.f32 %v24_v7, 127.0  ;;  %v27_v11 = vmin.f32 %v25_v8, 127.0 }
  0x1e   :  { %v29_v12 = vmul.f32 %v28_v9, %v26_v10  ;;  %v30_v13 = vmul.f32 %v28_v9, %v27_v11 }
  0x20   :  { %31 = vst [vmem:[%s88_s2] sm:$0xff] %v29_v12  ;;  %32 = vst [vmem:[%s88_s2 + $0x8] sm:$0xff] %v30_v13 }

// kernel: qact_forward.2
= control target key start
LH: loop header
LB: loop body
LE: loop exit
PB: predicated region body
PF: predicated region fallthrough
CT: control target
= control target key end

     0   :  { %s827_s9 = smov 0   ;;  %s829_s10 = smov 0   ;;  %s1033_s0 = inlined_call_operand.vmem [shape: f32[2,1024], index: 0, kind: input, shape index: {}]   ;;  %s1034_s1 = inlined_call_operand.vmem [shape: f32[16,128], index: 1, kind: output, shape index: {0}]   ;;  %s1035_s2 = inlined_call_operand.vmem [shape: f32[16,128], index: 2, kind: output, shape index: {1}]  }
   0x1   :  { %s831_s11 = smov 0  }
   0x2 LB: > { %s25_s12 = sadd.s32 1, %s804_s10  ;;  %p742_p0 = scmp.ge.s32.totalorder %s808_s11, 1  ;;  %s808_s11 = sphi %s831_s11, %s13_s11   ;;  %s804_s10 = sphi %s829_s10, %s1037_s10   ;;  %s800_s9 = sphi %s827_s9, %s1036_s9  }
   0x3   : > { %p27_p1 = scmp.ge.s32.totalorder %s25_s12, 2  ;;  %p143_p2 = scmp.lt.s32.totalorder %s808_s11, 3 }
   0x5   : > { %s1039_s12 = smov (%p27_p1, %s25_s12), 0  ;;  %p144_p3 = pnand %p742_p0, %p143_p2 }
   0x6   : > { %p174_p4 = scmp.lt.s32.totalorder (!%p144_p3), %s800_s9, 0  ;;  %s750_s13 = sshll.u32 (!%p144_p3), %s800_s9, 1  ;;  %v204_v0 = vlaneseq (!%p144_p3)  ;;  %v810_v2 = vmov (!%p144_p3), 1983009808   ;;  %v811_v5 = vmov (!%p144_p3), 1966171168  }
   0x7   : > { %147 = sbr.rel (%p144_p3) target bundleno = 299 (0x12b), region = 24  ;;  %v206_v1 = vstv (!%p144_p3), %s750_s13  ;;  %v213_v3 = vunpack.c.l.s4 (!%p144_p3), %v810_v2  ;;  %v340_v6 = vunpack.c.l.s4 (!%p144_p3), %v811_v5  ;;  %vm270_vm0 = vcmask (!%p144_p3), 1041408   ;;  %p185_p5 = scmp.lt.s32.totalorder (!%p144_p3), %s800_s9, 1 }
   0x8   : > { %v850_v4 = vshrl.u32 (!%p144_p3), %v204_v0, 7  ;;  %vm549_vm2 = vcmask (!%p144_p3), 1040384  }
   0x9   : > { %v214_v7 = vunpack.c.0.s8 (!%p144_p3), %v213_v3  ;;  %v341_v10 = vunpack.c.0.s8 (!%p144_p3), %v340_v6 }
   0xa   : > { %v853_v8 = vadd.s32 (!%p144_p3), %v206_v1, %v850_v4  ;;  %v511_v11 = vsub.s32 (!%p144_p3), 0, %v850_v4  ;;  %v515_v12 = vsub.s32 (!%p144_p3), 1, %v850_v4  ;;  %v519_v15 = vsub.s32 (!%p144_p3), 2, %v850_v4 }
   0xb   : > { %v217_v9 = vsub.s32 (!%p144_p3), %v214_v7, %v850_v4  ;;  %v523_v16 = vsub.s32 (!%p144_p3), 3, %v850_v4  ;;  %v527_v17 = vsub.s32 (!%p144_p3), 4, %v850_v4  ;;  %v866_v22 = vsub.s32 (!%p144_p3), %v341_v10, %v850_v4 }
   0xc   : > { %vm208_vm1 = vcmp.lt.s32.totalorder (!%p144_p3), %v853_v8, 2  ;;  %v531_v23 = vsub.s32 (!%p144_p3), 5, %v850_v4  ;;  %v535_v24 = vsub.s32 (!%p144_p3), 6, %v850_v4  ;;  %v539_v25 = vsub.s32 (!%p144_p3), 7, %v850_v4 }
   0xe   : > { %s175_s14 = scalar_select %p174_p4, %s800_s9, 0 }
   0xf   : > { %s1043_s9 = smov (!%p185_p5, %s800_s9), 1 }
  0x10   : > { %s1041_s14 = smov (!%p174_p4, %s175_s14), 0  ;;  %s748_s19 = sshll.u32 %s1043_s9, 3 }
  0x11   : > { %s753_s15 = sshll.u32 %s1041_s14, 4  ;;  %s188_s22 = scalar_lea.vmem %s1034_s1, %s748_s19 }
  0x12   : > { %s180_s18 = scalar_lea.vmem %s1033_s0, %s753_s15  ;;  %s192_s26 = scalar_lea.vmem %s1035_s2, %s748_s19 }
  0x13   : > { %v199_v13 = vld [vmem:[%s180_s18] sm:$0xff]  ;;  %v200_v14 = vld [vmem:[%s180_s18 + $0x8] sm:$0xff] }
  0x14   : > { %v211_v18 = vcombine.high %v199_v13, %v199_v13  ;;  %v218_v19 = vrot.slane %v199_v13, %v217_v9  ;;  %v228_v20 = vcombine.high %v200_v14, %v200_v14  ;;  %v235_v21 = vrot.slane %v200_v14, %v217_v9 }
  0x16   : > { %v871_v26 = vrot.slane %v211_v18, %v217_v9  ;;  %v873_v27 = vcombine.high %v218_v19, %v218_v19  ;;  %v875_v28 = vrot.slane %v228_v20, %v217_v9  ;;  %v877_v29 = vcombine.high %v235_v21, %v235_v21 }
  0x17   : > { %v253_v30 = vsel %vm208_vm1, %v218_v19, -inf  ;;  %v257_v31 = vsel %vm208_vm1, %v235_v21, -inf  ;;  %v885_v32 = vsel %vm208_vm1, %v218_v19, inf  ;;  %v889_v33 = vsel %vm208_vm1, %v235_v21, inf }
  0x18   : > { %v893_v34 = vcombine.high %v871_v26, %v871_v26  ;;  %v897_v35 = vcombine.high %v875_v28, %v875_v28  ;;  %v254_v36 = vsel %vm208_vm1, %v873_v27, -inf  ;;  %v255_v37 = vsel %vm208_vm1, %v871_v26, -inf }
  0x19   : > { %v258_v38 = vsel %vm208_vm1, %v877_v29, -inf  ;;  %v259_v39 = vsel %vm208_vm1, %v875_v28, -inf  ;;  %v271_v40 = vsel %vm270_vm0, %v253_v30, -inf  ;;  %v278_v41 = vsel %vm270_vm0, %v254_v36, -inf }
  0x1a   : > { %v256_v42 = vsel %vm208_vm1, %v893_v34, -inf  ;;  %v260_v43 = vsel %vm208_vm1, %v897_v35, -inf  ;;  %v272_v44 = vrot.slane %v271_v40, 4  ;;  %v279_v45 = vrot.slane %v278_v41, 4 }
  0x1b   : > { %v285_v46 = vsel %vm270_vm0, %v255_v37, -inf  ;;  %v292_v47 = vsel %vm270_vm0, %v256_v42, -inf  ;;  %v299_v48 = vsel %vm270_vm0, %v257_v31, -inf  ;;  %v306_v49 = vsel %vm270_vm0, %v258_v38, -inf }
  0x1c   : > { %v273_v50 = vmax.f32 %v271_v40, %v272_v44  ;;  %v280_v51 = vmax.f32 %v278_v41, %v279_v45  ;;  %v286_v52 = vrot.slane %v285_v46, 4  ;;  %v293_v53 = vrot.slane %v292_v47, 4 }
  0x1d   : > { %v300_v54 = vrot.slane %v299_v48, 4  ;;  %v307_v55 = vrot.slane %v306_v49, 4  ;;  %v313_v56 = vsel %vm270_vm0, %v259_v39, -inf  ;;  %v320_v57 = vsel %vm270_vm0, %v260_v43, -inf }
  0x1e   : > { %v274_v58 = vrot.slane %v273_v50, 2  ;;  %v281_v59 = vrot.slane %v280_v51, 2  ;;  %v287_v60 = vmax.f32 %v285_v46, %v286_v52  ;;  %v294_v61 = vmax.f32 %v292_v47, %v293_v53 }
  0x1f   : > { %v301_v62 = vmax.f32 %v299_v48, %v300_v54  ;;  %v308_v63 = vmax.f32 %v306_v49, %v307_v55  ;;  %v314_v0 = vrot.slane %v313_v56, 4  ;;  %v321_v1 = vrot.slane %v320_v57, 4 }
  0x20   : > { %v275_v2 = vmax.f32 %v273_v50, %v274_v58  ;;  %v282_v3 = vmax.f32 %v280_v51, %v281_v59  ;;  %v288_v5 = vrot.slane %v287_v60, 2  ;;  %v295_v6 = vrot.slane %v294_v61, 2 }
  0x21   : > { %v302_v7 = vrot.slane %v301_v62, 2  ;;  %v309_v9 = vrot.slane %v308_v63, 2  ;;  %v315_v10 = vmax.f32 %v313_v56, %v314_v0  ;;  %v322_v13 = vmax.f32 %v320_v57, %v321_v1 }
  0x22   : > { %v276_v14 = vrot.slane %v275_v2, 1  ;;  %v283_v18 = vrot.slane %v282_v3, 1  ;;  %v289_v19 = vmax.f32 %v287_v60, %v288_v5  ;;  %v296_v20 = vmax.f32 %v294_v61, %v295_v6 }
  0x23   : > { %v303_v21 = vmax.f32 %v301_v62, %v302_v7  ;;  %v310_v30 = vmax.f32 %v308_v63, %v309_v9  ;;  %v316_v31 = vrot.slane %v315_v10, 2  ;;  %v323_v36 = vrot.slane %v322_v13, 2 }
  0x24   : > { %v277_v37 = vmax.f32 %v275_v2, %v276_v14  ;;  %v284_v38 = vmax.f32 %v282_v3, %v283_v18  ;;  %v290_v39 = vrot.slane %v289_v19, 1  ;;  %v297_v40 = vrot.slane %v296_v20, 1 }
  0x25   : > { %v304_v41 = vrot.slane %v303_v21, 1  ;;  %v311_v42 = vrot.slane %v310_v30, 1  ;;  %v317_v43 = vmax.f32 %v315_v10, %v316_v31  ;;  %v324_v44 = vmax.f32 %v322_v13, %v323_v36 }
  0x26   : > { %v291_v45 = vmax.f32 %v289_v19, %v290_v39  ;;  %v298_v46 = vmax.f32 %v296_v20, %v297_v40  ;;  %v335_v47 = vcombine.low %v277_v37, %v284_v38  ;;  %v262_v48 = vsel %vm208_vm1, %v873_v27, inf }
  0x27   : > { %v305_v49 = vmax.f32 %v303_v21, %v304_v41  ;;  %v312_v50 = vmax.f32 %v310_v30, %v311_v42  ;;  %v318_v51 = vrot.slane %v317_v43, 1  ;;  %v325_v52 = vrot.slane %v324_v44, 1 }
  0x28   : > { %v336_v53 = vcombine.low %v291_v45, %v298_v46  ;;  %v345_v54 = vrot.slane %v335_v47, %v866_v22  ;;  %v263_v55 = vsel %vm208_vm1, %v871_v26, inf  ;;  %v264_v56 = vsel %vm208_vm1, %v893_v34, inf }
  0x29   : > { %v319_v57 = vmax.f32 %v317_v43, %v318_v51  ;;  %v326_v58 = vmax.f32 %v324_v44, %v325_v52  ;;  %v337_v59 = vcombine.low %v305_v49, %v312_v50  ;;  %v266_v27 = vsel %vm208_vm1, %v877_v29, inf }
  0x2a   : > { %v352_v60 = vrot.slane %v336_v53, %v866_v22  ;;  %v267_v61 = vsel %vm208_vm1, %v875_v28, inf  ;;  %v945_v26 = vsel %vm208_vm1, %v897_v35, inf  ;;  %v388_v34 = vsel %vm270_vm0, %v885_v32, inf }
  0x2b   : > { %v338_v62 = vcombine.low %v319_v57, %v326_v58  ;;  %v359_v63 = vrot.slane %v337_v59, %v866_v22  ;;  %v389_v0 = vrot.slane %v388_v34, 4  ;;  %v395_v29 = vsel %vm270_vm0, %v262_v48, inf }
  0x2c   : > { %v367_v1 = vcombine.low %v345_v54, %v352_v60  ;;  %v396_v2 = vrot.slane %v395_v29, 4  ;;  %v402_v3 = vsel %vm270_vm0, %v263_v55, inf  ;;  %v409_v28 = vsel %vm270_vm0, %v264_v56, inf }
  0x2d   : > { %v366_v8 = vrot.slane %v338_v62, %v866_v22  ;;  %v390_v35 = vmin.f32 %v388_v34, %v389_v0  ;;  %v403_v5 = vrot.slane %v402_v3, 4  ;;  %v410_v6 = vrot.slane %v409_v28, 4 }
  0x2e   : > { %v375_v32 = vrot.slane %v367_v1, %v866_v22  ;;  %v397_v7 = vmin.f32 %v395_v29, %v396_v2  ;;  %v416_v9 = vsel %vm270_vm0, %v889_v33, inf  ;;  %v423_v10 = vsel %vm270_vm0, %v266_v27, inf }
  0x2f   : > { %v368_v13 = vcombine.low %v359_v63, %v366_v8  ;;  %v391_v14 = vrot.slane %v390_v35, 2  ;;  %v404_v18 = vmin.f32 %v402_v3, %v403_v5  ;;  %v411_v19 = vmin.f32 %v409_v28, %v410_v6 }
  0x30   : > { %v398_v20 = vrot.slane %v397_v7, 2  ;;  %v417_v21 = vrot.slane %v416_v9, 4  ;;  %v424_v30 = vrot.slane %v423_v10, 4  ;;  %v430_v31 = vsel %vm270_vm0, %v267_v61, inf }
  0x31   : > { %v382_v36 = vrot.slane %v368_v13, %v866_v22  ;;  %v392_v37 = vmin.f32 %v390_v35, %v391_v14  ;;  %v405_v38 = vrot.slane %v404_v18, 2  ;;  %v412_v39 = vrot.slane %v411_v19, 2 }
  0x32   : > { %v399_v40 = vmin.f32 %v397_v7, %v398_v20  ;;  %v418_v41 = vmin.f32 %v416_v9, %v417_v21  ;;  %v425_v42 = vmin.f32 %v423_v10, %v424_v30  ;;  %v431_v33 = vrot.slane %v430_v31, 4 }
  0x33   : > { %v383_v43 = vcombine.low %v375_v32, %v382_v36  ;;  %v393_v44 = vrot.slane %v392_v37, 1  ;;  %v406_v45 = vmin.f32 %v404_v18, %v405_v38  ;;  %v413_v46 = vmin.f32 %v411_v19, %v412_v39 }
  0x34   : > { %v400_v47 = vrot.slane %v399_v40, 1  ;;  %v419_v48 = vrot.slane %v418_v41, 2  ;;  %v426_v49 = vrot.slane %v425_v42, 2  ;;  %v432_v50 = vmin.f32 %v430_v31, %v431_v33 }
  0x35   : > { %v512_v51 = vrot.slane %v383_v43, %v511_v11  ;;  %v516_v52 = vrot.slane %v383_v43, %v515_v12  ;;  %v520_v53 = vrot.slane %v383_v43, %v519_v15  ;;  %v524_v54 = vrot.slane %v383_v43, %v523_v16 }
  0x36   : > { %v528_v55 = vrot.slane %v383_v43, %v527_v17  ;;  %v532_v56 = vrot.slane %v383_v43, %v531_v23  ;;  %v536_v57 = vrot.slane %v383_v43, %v535_v24  ;;  %v540_v58 = vrot.slane %v383_v43, %v539_v25 }
  0x37   : > { %v550_v59 = vsel %vm549_vm2, %v512_v51, -inf  ;;  %v551_v27 = vsel %vm549_vm2, %v516_v52, -inf  ;;  %v552_v60 = vsel %vm549_vm2, %v520_v53, -inf  ;;  %v553_v61 = vsel %vm549_vm2, %v524_v54, -inf }
  0x38   : > { %v554_v34 = vsel %vm549_vm2, %v528_v55, -inf  ;;  %v556_v62 = vsel %vm549_vm2, %v532_v56, -inf  ;;  %v558_v63 = vsel %vm549_vm2, %v536_v57, -inf  ;;  %v560_v0 = vsel %vm549_vm2, %v540_v58, -inf }
  0x39   : > { %v555_v29 = vmax.f32 %v550_v59, %v554_v34  ;;  %v557_v1 = vmax.f32 %v551_v27, %v556_v62  ;;  %v559_v2 = vmax.f32 %v552_v60, %v558_v63  ;;  %v561_v3 = vmax.f32 %v553_v61, %v560_v0 }
  0x3a   : > { %v394_v28 = vmin.f32 %v392_v37, %v393_v44  ;;  %v401_v8 = vmin.f32 %v399_v40, %v400_v47  ;;  %v407_v35 = vrot.slane %v406_v45, 1  ;;  %v414_v5 = vrot.slane %v413_v46, 1 }
  0x3b   : > { %v562_v6 = vmax.f32 %v555_v29, %v557_v1  ;;  %v563_v32 = vmax.f32 %v559_v2, %v561_v3  ;;  %v420_v7 = vmin.f32 %v418_v41, %v419_v48  ;;  %v427_v9 = vmin.f32 %v425_v42, %v426_v49 }
  0x3c   : > { %v408_v10 = vmin.f32 %v406_v45, %v407_v35  ;;  %v415_v13 = vmin.f32 %v413_v46, %v414_v5  ;;  %v433_v14 = vrot.slane %v432_v50, 2  ;;  %v437_v18 = vsel %vm270_vm0, %v945_v26, inf }
  0x3d   : > { %v564_v19 = vmax.f32 %v562_v6, %v563_v32  ;;  %v421_v20 = vrot.slane %v420_v7, 1  ;;  %v428_v21 = vrot.slane %v427_v9, 1  ;;  %v438_v30 = vrot.slane %v437_v18, 4 }
  0x3e   : > { %v434_v31 = vmin.f32 %v432_v50, %v433_v14  ;;  %v452_v37 = vcombine.low %v394_v28, %v401_v8  ;;  %v453_v38 = vcombine.low %v408_v10, %v415_v13 }
  0x3f   : > { %565 = vmax.xlane.f32.xlu0 %v564_v19  ;;  %v439_v36 = vmin.f32 %v437_v18, %v438_v30  ;;  %v422_v39 = vmin.f32 %v420_v7, %v421_v20  ;;  %v429_v40 = vmin.f32 %v427_v9, %v428_v21 }
  0x40   : > { %v435_v33 = vrot.slane %v434_v31, 1  ;;  %v462_v43 = vrot.slane %v452_v37, %v866_v22  ;;  %v469_v26 = vrot.slane %v453_v38, %v866_v22 }
  0x41   : > { %v440_v41 = vrot.slane %v439_v36, 2  ;;  %v454_v46 = vcombine.low %v422_v39, %v429_v40 }
  0x42   : > { %v436_v44 = vmin.f32 %v434_v31, %v435_v33  ;;  %v484_v50 = vcombine.low %v462_v43, %v469_v26 }
  0x43   : > { %v441_v42 = vmin.f32 %v439_v36, %v440_v41  ;;  %v476_v49 = vrot.slane %v454_v46, %v866_v22 }
  0x44   : > { %v492_v53 = vrot.slane %v484_v50, %v866_v22 }
  0x45   : > { %v442_v45 = vrot.slane %v441_v42, 1 }
  0x47   : > { %v443_v47 = vmin.f32 %v441_v42, %v442_v45 }
  0x49   : > { %v455_v48 = vcombine.low %v436_v44, %v443_v47 }
  0x4b   : > { %v483_v51 = vrot.slane %v455_v48, %v866_v22 }
  0x4d   : > { %v485_v52 = vcombine.low %v476_v49, %v483_v51 }
  0x4f   : > { %v499_v54 = vrot.slane %v485_v52, %v866_v22 }
  0x51   : > { %v500_v55 = vcombine.low %v492_v53, %v499_v54 }
  0x53   : > { %v582_v56 = vrot.slane %v500_v55, %v511_v11  ;;  %v586_v57 = vrot.slane %v500_v55, %v515_v12  ;;  %v590_v58 = vrot.slane %v500_v55, %v519_v15  ;;  %v594_v59 = vrot.slane %v500_v55, %v523_v16 }
  0x54   : > { %v598_v27 = vrot.slane %v500_v55, %v527_v17  ;;  %v602_v60 = vrot.slane %v500_v55, %v531_v23  ;;  %v606_v22 = vrot.slane %v500_v55, %v535_v24  ;;  %v610_v11 = vrot.slane %v500_v55, %v539_v25 }
  0x55   : > { %v619_v12 = vsel %vm549_vm2, %v582_v56, inf  ;;  %v620_v61 = vsel %vm549_vm2, %v586_v57, inf  ;;  %v621_v15 = vsel %vm549_vm2, %v590_v58, inf  ;;  %v622_v16 = vsel %vm549_vm2, %v594_v59, inf }
  0x56   : > { %v623_v34 = vsel %vm549_vm2, %v598_v27, inf  ;;  %v625_v17 = vsel %vm549_vm2, %v602_v60, inf  ;;  %v627_v23 = vsel %vm549_vm2, %v606_v22, inf  ;;  %v629_v62 = vsel %vm549_vm2, %v610_v11, inf }
  0x57   : > { %v624_v24 = vmin.f32 %v619_v12, %v623_v34  ;;  %v626_v63 = vmin.f32 %v620_v61, %v625_v17  ;;  %v628_v4 = vmin.f32 %v621_v15, %v627_v23  ;;  %v630_v25 = vmin.f32 %v622_v16, %v629_v62 }
  0x59   : > { %v631_v0 = vmin.f32 %v624_v24, %v626_v63  ;;  %v632_v29 = vmin.f32 %v628_v4, %v630_v25 }
  0x5b   : > { %v633_v1 = vmin.f32 %v631_v0, %v632_v29 }
  0x5d   : > { %634 = vmin.xlane.f32.xlu0 %v633_v1 }
  0xcc   : > { %v566_v2 = vpop.xlane.xlu0 %565 }
  0xcd   : > { %v567_v3 = vrot.slane %v566_v2, 4 }
  0xcf   : > { %v568_v28 = vmax.f32 %v566_v2, %v567_v3 }
  0xd1   : > { %v569_v8 = vrot.slane %v568_v28, 2 }
  0xd3   : > { %v570_v35 = vmax.f32 %v568_v28, %v569_v8 }
  0xd5   : > { %v571_v5 = vrot.slane %v570_v35, 1 }
  0xd7   : > { %v572_v6 = vmax.f32 %v570_v35, %v571_v5 }
  0xd9   : > { %754 = vpush %v572_v6 }
  0xea   : > { %v635_v32 = vpop.xlane.xlu0 %634 }
  0xeb   : > { %v636_v7 = vrot.slane %v635_v32, 4 }
  0xed   : > { %v637_v9 = vmin.f32 %v635_v32, %v636_v7 }
  0xef   : > { %v638_v10 = vrot.slane %v637_v9, 2 }
  0xf1   : > { %v639_v13 = vmin.f32 %v637_v9, %v638_v10 }
  0xf3   : > { %v640_v14 = vrot.slane %v639_v13, 1 }
  0xf5   : > { %v641_v18 = vmin.f32 %v639_v13, %v640_v14 }
  0xf7   : > { %756 = vpush %v641_v18 }
 0x10a   : > { %s755_s23 = spop %754 }
 0x10b   : > { %v574_v19 = vstv %s755_s23 }
 0x10c   : > { %576 = vst [vmem:[%s188_s22] sm:$0xff] %v574_v19 }
 0x128   : > { %s757_s27 = spop %756 }
 0x129   : > { %v643_v20 = vstv %s757_s27 }
 0x12a   : > { %645 = vst [vmem:[%s192_s26] sm:$0xff] %v643_v20 }
 0x12b PF: > { %s13_s11 = sadd.s32 1, %s808_s11   ;;  %s1036_s9 = smov %s804_s10 }
 0x12c   : > { %p10_p6 = scmp.ge.s32.totalorder %s13_s11, 4   ;;  %s1037_s10 = smov %s1039_s12 }
 0x12e   :  { %12 = sbr.rel (!%p10_p6) target bundleno = 2 (0x2), region = 74 }

</bundles_post_ra>
